<compile_context>
chip_gen: v6e
topology: v6e:2x2x1
jax: 0.10.0
libtpu: 0.0.40
codegen_flags: <defaults>
</compile_context>

<pallas_src>
import functools

import jax
import jax.numpy as jnp
from jax.experimental import pallas as pl
from jax.experimental.pallas import tpu as pltpu

BN_EPS = 1e-5
LANE = 128


def _round_up(x, m):
    return ((x + m - 1) // m) * m


# ---------------------------------------------------------------------------
# Fused whole-MLP kernel
# ---------------------------------------------------------------------------
def _mlp_kernel(*refs, num_hidden):
    """refs = [x,
               w_in,  vec_in  (rows: [bias, gamma, beta]),
               (w_h,  vec_h   (rows: [gamma, beta])) * num_hidden,
               w_out, b_out,
               o_ref]
    Weights are [in, out]; output feature dims zero-padded to 128 lanes."""
    x_ref = refs[0]
    o_ref = refs[-1]
    params = refs[1:-1]
    idx = 0

    def take(n):
        nonlocal idx
        r = params[idx:idx + n]
        idx += n
        return r

    def matmul(y, w_ref):
        w = w_ref[...]
        # bf16 (or f32) MXU operands, always f32 accumulation.
        return jnp.dot(y.astype(w.dtype), w, preferred_element_type=jnp.float32)

    def batchnorm(y, gamma, beta):
        # Training-mode BN: two-pass (robust) biased batch statistics.
        mean = jnp.mean(y, axis=0, keepdims=True)
        d = y - mean
        var = jnp.mean(d * d, axis=0, keepdims=True)
        scale = jax.lax.rsqrt(var + BN_EPS) * gamma      # [1,F]; gamma folded in
        return d * scale + beta                          # 2 big-tensor VPU ops

    y = x_ref[...].astype(jnp.float32)

    # input layer: Linear(+bias) -> ReLU -> BN
    w_ref, vec_ref = take(2)
    y = jnp.maximum(matmul(y, w_ref) + vec_ref[0:1, :], 0.0)
    y = batchnorm(y, vec_ref[1:2, :], vec_ref[2:3, :])

    # hidden layers: Linear (bias dropped; cancelled by BN) -> BN -> ReLU
    for _ in range(num_hidden):
        w_ref, vec_ref = take(2)
        y = matmul(y, w_ref)
        y = jnp.maximum(batchnorm(y, vec_ref[0:1, :], vec_ref[1:2, :]), 0.0)

    # output layer: plain Linear (bias kept; no BN follows)
    w_ref, b_ref = take(2)
    o_ref[...] = (matmul(y, w_ref) + b_ref[...]).astype(o_ref.dtype)


def mlp_forward(prepared, x):
    """x: [N, in_features] float32. Returns [N, num_classes] float32."""
    n, fin = x.shape
    flat = prepared["flat"]
    kernel = functools.partial(_mlp_kernel, num_hidden=prepared["num_hidden"])
    vmem = pl.BlockSpec(memory_space=pltpu.MemorySpace.VMEM)

    # VMEM cap sized from the actual resident footprint (params + x + out +
    # a few live activation slabs), 2x margin for compiler temporaries,
    # clamped to [16 MiB, 64 MiB] so it is valid on every generation.
    act_bytes = 4 * n * (fin + 3 * prepared["max_width_padded"] + prepared["out_padded"])
    footprint = prepared["param_bytes"] + act_bytes
    vmem_limit = int(min(64 << 20, max(16 << 20, 2 * footprint)))

    out_p = pl.pallas_call(
        kernel,
        out_shape=jax.ShapeDtypeStruct((n, prepared["out_padded"]), jnp.float32),
        in_specs=[vmem] * (1 + len(flat)),
        out_specs=vmem,
        compiler_params=pltpu.CompilerParams(vmem_limit_bytes=vmem_limit),
    )(x, *flat)
    return out_p[:, :prepared["num_classes"]]


# ---------------------------------------------------------------------------
# Parameter construction (PyTorch-style) and one-time kernel preparation
# ---------------------------------------------------------------------------
def init_linear(key, fan_in, fan_out):
    """PyTorch-style Linear init: U(-1/sqrt(fan_in), 1/sqrt(fan_in))."""
    kw, kb = jax.random.split(key)
    bound = 1.0 / jnp.sqrt(jnp.asarray(fan_in, jnp.float32))
    w = jax.random.uniform(kw, (fan_out, fan_in), jnp.float32, -bound, bound)
    b = jax.random.uniform(kb, (fan_out,), jnp.float32, -bound, bound)
    return w, b


def make_mlp_params(key, in_features, num_classes, hidden_sizes):
    keys = jax.random.split(key, len(hidden_sizes) + 1)
    params = {}
    w, b = init_linear(keys[0], in_features, hidden_sizes[0])
    params["input"] = dict(w=w, b=b,
                           gamma=jnp.ones((hidden_sizes[0],), jnp.float32),
                           beta=jnp.zeros((hidden_sizes[0],), jnp.float32))
    params["hidden"] = []
    for i in range(len(hidden_sizes) - 1):
        w, b = init_linear(keys[i + 1], hidden_sizes[i], hidden_sizes[i + 1])
        params["hidden"].append(dict(
            w=w, b=b,
            gamma=jnp.ones((hidden_sizes[i + 1],), jnp.float32),
            beta=jnp.zeros((hidden_sizes[i + 1],), jnp.float32)))
    w, b = init_linear(keys[-1], hidden_sizes[-1], num_classes)
    params["out"] = dict(w=w, b=b)
    return params


def prepare_mlp_params(params, weight_dtype=jnp.float32):
    """One-time packing for the kernel:
      * weights transposed to [in, out]; output feature dims zero-padded to a
        multiple of 128 lanes (lane-dense MXU operands / stores); the very
        first K (= in_features) stays UN-padded.
      * per-layer 1-D vectors packed row-wise into ONE small f32 array per
        layer.  Padded lanes (incl. gamma) are 0, so they stay exactly zero.
      * weight matrices optionally stored in bf16 (v6e/v7x MXU fast path);
        vectors / BN math stay f32."""
    def pad_w(w, rows, cols):            # w: [out, in] torch layout
        wt = jnp.transpose(w)            # -> [in, out]
        wt = jnp.pad(wt, ((0, rows - wt.shape[0]), (0, cols - wt.shape[1])))
        return wt.astype(weight_dtype)

    def pack_vecs(vecs, cols):
        rows = [jnp.pad(v.astype(jnp.float32), (0, cols - v.shape[0])) for v in vecs]
        return jnp.stack(rows, axis=0)   # [len(vecs), cols], f32

    flat = []
    fin = params["input"]["w"].shape[1]

    # input layer (keep bias: ReLU sits between Linear and BN)
    p = params["input"]
    f0_p = _round_up(p["w"].shape[0], LANE)
    flat.append(pad_w(p["w"], fin, f0_p))
    flat.append(pack_vecs([p["b"], p["gamma"], p["beta"]], f0_p))
    prev_p = f0_p
    max_p = f0_p

    # hidden layers (bias dropped: cancelled by BN mean subtraction)
    for p in params["hidden"]:
        fo_p = _round_up(p["w"].shape[0], LANE)
        flat.append(pad_w(p["w"], prev_p, fo_p))
        flat.append(pack_vecs([p["gamma"], p["beta"]], fo_p))
        prev_p = fo_p
        max_p = max(max_p, fo_p)

    # output layer
    p = params["out"]
    num_classes = p["w"].shape[0]
    out_p = _round_up(num_classes, LANE)
    flat.append(pad_w(p["w"], prev_p, out_p))
    flat.append(pack_vecs([p["b"]], out_p))

    param_bytes = sum(int(a.size) * a.dtype.itemsize for a in flat)

    return dict(flat=flat,
                num_hidden=len(params["hidden"]),
                out_padded=out_p,
                max_width_padded=max_p,
                num_classes=num_classes,
                param_bytes=param_bytes)


# ---------------------------------------------------------------------------
# Pure-JAX references (training-mode BN semantics)
# ---------------------------------------------------------------------------
def _bn_ref(y, gamma, beta):
    mean = jnp.mean(y, axis=0, keepdims=True)
    var = jnp.mean((y - mean) ** 2, axis=0, keepdims=True)
    return (y - mean) / jnp.sqrt(var + BN_EPS) * gamma + beta


def mlp_reference(params, x):
    """Exact PyTorch-module semantics (f32 everywhere, hidden biases kept)."""
    p = params["input"]
    y = jnp.maximum(x @ p["w"].T + p["b"], 0.0)
    y = _bn_ref(y, p["gamma"], p["beta"])
    for p in params["hidden"]:
        y = y @ p["w"].T + p["b"]
        y = jnp.maximum(_bn_ref(y, p["gamma"], p["beta"]), 0.0)
    p = params["out"]
    return y @ p["w"].T + p["b"]


def mlp_reference_bf16(params, x):
    """Mirrors the kernel's bf16-MXU fast path: bf16 weight/activation operands,
    f32 accumulation, f32 BN math, hidden biases dropped (cancelled by BN)."""
    def dot(a, w):
        return jnp.dot(a.astype(jnp.bfloat16),
                       jnp.transpose(w).astype(jnp.bfloat16),
                       preferred_element_type=jnp.float32)

    p = params["input"]
    y = jnp.maximum(dot(x, p["w"]) + p["b"], 0.0)
    y = _bn_ref(y, p["gamma"], p["beta"])
    for p in params["hidden"]:
        y = jnp.maximum(_bn_ref(dot(y, p["w"]), p["gamma"], p["beta"]), 0.0)
    p = params["out"]
    return dot(y, p["w"]) + p["b"]


if __name__ == "__main__":
    key = jax.random.PRNGKey(0)
    k_param, k_x = jax.random.split(key)

    batch = 8
    in_features = 32
    hidden_sizes = [64, 32]
    num_classes = 10

    params = make_mlp_params(k_param, in_features, num_classes, hidden_sizes)
    x = jax.random.normal(k_x, (batch, in_features), jnp.float32)

    # --- f32 weights: exact module semantics, tight tolerance ---------------
    prep_f32 = prepare_mlp_params(params, weight_dtype=jnp.float32)
    out_f32 = jax.block_until_ready(mlp_forward(prep_f32, x))
    ref_f32 = mlp_reference(params, x)
    assert out_f32.shape == (batch, num_classes)
    assert jnp.allclose(out_f32, ref_f32, atol=2e-4, rtol=2e-4), "f32 mismatch vs reference"

    # --- bf16 MXU operands (v6e/v7x fast path): f32 accumulate + f32 BN -----
    prep_bf16 = prepare_mlp_params(params, weight_dtype=jnp.bfloat16)
    out_bf16 = jax.block_until_ready(mlp_forward(prep_bf16, x))
    ref_bf16 = mlp_reference_bf16(params, x)
    assert out_bf16.shape == (batch, num_classes)
    assert jnp.allclose(out_bf16, ref_bf16, atol=2e-2, rtol=2e-2), "bf16 mismatch vs reference"

    print("KERNEL_OK")
</pallas_src>

<mosaic_0001>
module attributes {stable_mosaic.version = 11 : i64} {
  func.func @_mlp_kernel(%arg0: memref<8x32xf32, #tpu.memory_space<vmem>>, %arg1: memref<32x128xf32, #tpu.memory_space<vmem>>, %arg2: memref<3x128xf32, #tpu.memory_space<vmem>>, %arg3: memref<128x128xf32, #tpu.memory_space<vmem>>, %arg4: memref<2x128xf32, #tpu.memory_space<vmem>>, %arg5: memref<128x128xf32, #tpu.memory_space<vmem>>, %arg6: memref<1x128xf32, #tpu.memory_space<vmem>>, %arg7: memref<8x128xf32, #tpu.memory_space<vmem>>) attributes {dimension_semantics = [], scalar_prefetch = 0 : i64, scratch_operands = 0 : i64, tpu.core_type = #tpu.core_type<tc>} {
    %c0 = arith.constant 0 : index
    %c0_0 = arith.constant 0 : index
    %0 = vector.load %arg0[%c0, %c0_0] : memref<8x32xf32, #tpu.memory_space<vmem>>, vector<8x32xf32>
    %c0_1 = arith.constant 0 : index
    %c0_2 = arith.constant 0 : index
    %1 = vector.load %arg1[%c0_1, %c0_2] : memref<32x128xf32, #tpu.memory_space<vmem>>, vector<32x128xf32>
    %cst = arith.constant dense<0.000000e+00> : vector<8x128xf32>
    %2 = tpu.matmul %0, %1, %cst {dimension_numbers = #tpu.dot_dimension_numbers<[1], [0], [0], [1], [0, 0, 1, 1], [], []>} : vector<8x32xf32>, vector<32x128xf32>, vector<8x128xf32> -> vector<8x128xf32>
    %c0_3 = arith.constant 0 : index
    %c0_4 = arith.constant 0 : index
    %3 = vector.load %arg2[%c0_3, %c0_4] : memref<3x128xf32, #tpu.memory_space<vmem>>, vector<1x128xf32>
    %4 = vector.broadcast %3 : vector<1x128xf32> to vector<8x128xf32>
    %5 = arith.addf %2, %4 : vector<8x128xf32>
    %cst_5 = arith.constant 0.000000e+00 : f32
    %6 = vector.broadcast %cst_5 : f32 to vector<8x128xf32>
    %7 = arith.maximumf %5, %6 : vector<8x128xf32>
    %c1 = arith.constant 1 : index
    %c0_6 = arith.constant 0 : index
    %8 = vector.load %arg2[%c1, %c0_6] : memref<3x128xf32, #tpu.memory_space<vmem>>, vector<1x128xf32>
    %c2 = arith.constant 2 : index
    %c0_7 = arith.constant 0 : index
    %9 = vector.load %arg2[%c2, %c0_7] : memref<3x128xf32, #tpu.memory_space<vmem>>, vector<1x128xf32>
    %cst_8 = arith.constant dense<0.000000e+00> : vector<128xf32>
    %10 = vector.multi_reduction <add>, %7, %cst_8 [0] : vector<8x128xf32> to vector<128xf32>
    %11 = vector.shape_cast %10 : vector<128xf32> to vector<1x128xf32>
    %cst_9 = arith.constant 8.000000e+00 : f32
    %12 = vector.broadcast %cst_9 : f32 to vector<1x128xf32>
    %13 = arith.divf %11, %12 : vector<1x128xf32>
    %14 = vector.broadcast %13 : vector<1x128xf32> to vector<8x128xf32>
    %15 = arith.subf %7, %14 : vector<8x128xf32>
    %16 = arith.mulf %15, %15 : vector<8x128xf32>
    %cst_10 = arith.constant dense<0.000000e+00> : vector<128xf32>
    %17 = vector.multi_reduction <add>, %16, %cst_10 [0] : vector<8x128xf32> to vector<128xf32>
    %18 = vector.shape_cast %17 : vector<128xf32> to vector<1x128xf32>
    %cst_11 = arith.constant 8.000000e+00 : f32
    %19 = vector.broadcast %cst_11 : f32 to vector<1x128xf32>
    %20 = arith.divf %18, %19 : vector<1x128xf32>
    %cst_12 = arith.constant 9.99999974E-6 : f32
    %21 = vector.broadcast %cst_12 : f32 to vector<1x128xf32>
    %22 = arith.addf %20, %21 : vector<1x128xf32>
    %23 = math.rsqrt %22 : vector<1x128xf32>
    %24 = arith.mulf %23, %8 : vector<1x128xf32>
    %25 = vector.broadcast %24 : vector<1x128xf32> to vector<8x128xf32>
    %26 = arith.mulf %15, %25 : vector<8x128xf32>
    %27 = vector.broadcast %9 : vector<1x128xf32> to vector<8x128xf32>
    %28 = arith.addf %26, %27 : vector<8x128xf32>
    %c0_13 = arith.constant 0 : index
    %c0_14 = arith.constant 0 : index
    %29 = vector.load %arg3[%c0_13, %c0_14] : memref<128x128xf32, #tpu.memory_space<vmem>>, vector<128x128xf32>
    %cst_15 = arith.constant dense<0.000000e+00> : vector<8x128xf32>
    %30 = tpu.matmul %28, %29, %cst_15 {dimension_numbers = #tpu.dot_dimension_numbers<[1], [0], [0], [1], [0, 0, 1, 1], [], []>} : vector<8x128xf32>, vector<128x128xf32>, vector<8x128xf32> -> vector<8x128xf32>
    %c0_16 = arith.constant 0 : index
    %c0_17 = arith.constant 0 : index
    %31 = vector.load %arg4[%c0_16, %c0_17] : memref<2x128xf32, #tpu.memory_space<vmem>>, vector<1x128xf32>
    %c1_18 = arith.constant 1 : index
    %c0_19 = arith.constant 0 : index
    %32 = vector.load %arg4[%c1_18, %c0_19] : memref<2x128xf32, #tpu.memory_space<vmem>>, vector<1x128xf32>
    %cst_20 = arith.constant dense<0.000000e+00> : vector<128xf32>
    %33 = vector.multi_reduction <add>, %30, %cst_20 [0] : vector<8x128xf32> to vector<128xf32>
    %34 = vector.shape_cast %33 : vector<128xf32> to vector<1x128xf32>
    %cst_21 = arith.constant 8.000000e+00 : f32
    %35 = vector.broadcast %cst_21 : f32 to vector<1x128xf32>
    %36 = arith.divf %34, %35 : vector<1x128xf32>
    %37 = vector.broadcast %36 : vector<1x128xf32> to vector<8x128xf32>
    %38 = arith.subf %30, %37 : vector<8x128xf32>
    %39 = arith.mulf %38, %38 : vector<8x128xf32>
    %cst_22 = arith.constant dense<0.000000e+00> : vector<128xf32>
    %40 = vector.multi_reduction <add>, %39, %cst_22 [0] : vector<8x128xf32> to vector<128xf32>
    %41 = vector.shape_cast %40 : vector<128xf32> to vector<1x128xf32>
    %cst_23 = arith.constant 8.000000e+00 : f32
    %42 = vector.broadcast %cst_23 : f32 to vector<1x128xf32>
    %43 = arith.divf %41, %42 : vector<1x128xf32>
    %cst_24 = arith.constant 9.99999974E-6 : f32
    %44 = vector.broadcast %cst_24 : f32 to vector<1x128xf32>
    %45 = arith.addf %43, %44 : vector<1x128xf32>
    %46 = math.rsqrt %45 : vector<1x128xf32>
    %47 = arith.mulf %46, %31 : vector<1x128xf32>
    %48 = vector.broadcast %47 : vector<1x128xf32> to vector<8x128xf32>
    %49 = arith.mulf %38, %48 : vector<8x128xf32>
    %50 = vector.broadcast %32 : vector<1x128xf32> to vector<8x128xf32>
    %51 = arith.addf %49, %50 : vector<8x128xf32>
    %cst_25 = arith.constant 0.000000e+00 : f32
    %52 = vector.broadcast %cst_25 : f32 to vector<8x128xf32>
    %53 = arith.maximumf %51, %52 : vector<8x128xf32>
    %c0_26 = arith.constant 0 : index
    %c0_27 = arith.constant 0 : index
    %54 = vector.load %arg5[%c0_26, %c0_27] : memref<128x128xf32, #tpu.memory_space<vmem>>, vector<128x128xf32>
    %cst_28 = arith.constant dense<0.000000e+00> : vector<8x128xf32>
    %55 = tpu.matmul %53, %54, %cst_28 {dimension_numbers = #tpu.dot_dimension_numbers<[1], [0], [0], [1], [0, 0, 1, 1], [], []>} : vector<8x128xf32>, vector<128x128xf32>, vector<8x128xf32> -> vector<8x128xf32>
    %c0_29 = arith.constant 0 : index
    %c0_30 = arith.constant 0 : index
    %56 = vector.load %arg6[%c0_29, %c0_30] : memref<1x128xf32, #tpu.memory_space<vmem>>, vector<1x128xf32>
    %57 = vector.broadcast %56 : vector<1x128xf32> to vector<8x128xf32>
    %58 = arith.addf %55, %57 : vector<8x128xf32>
    %c0_31 = arith.constant 0 : index
    %c0_32 = arith.constant 0 : index
    %59 = vector.load %arg7[%c0_31, %c0_32] : memref<8x128xf32, #tpu.memory_space<vmem>>, vector<8x128xf32>
    tpu.vector_store %arg7[%c0_31, %c0_32], %58 {strides = array<i32>} : memref<8x128xf32, #tpu.memory_space<vmem>>, vector<8x128xf32>,
    return
  }
}

</mosaic_0001>

<bundles_post_ra>
// kernel: tpu_custom_call.1
= control target key start
LH: loop header
LB: loop body
LE: loop exit
PB: predicated region body
PF: predicated region fallthrough
CT: control target
= control target key end

     0   :  { %12 = vsyncpa [#allocation3], 0  ;;  %s839_s0 = inlined_call_operand.hbm [shape: f32[8,32], index: 0, kind: input, shape index: {}]   ;;  %s840_s1 = inlined_call_operand.hbm [shape: f32[32,128], index: 1, kind: input, shape index: {}]   ;;  %s841_s2 = inlined_call_operand.hbm [shape: f32[3,128], index: 2, kind: input, shape index: {}]   ;;  %s842_s3 = inlined_call_operand.hbm [shape: f32[128,128], index: 3, kind: input, shape index: {}]   ;;  %s843_s4 = inlined_call_operand.vmem [shape: f32[2,128], index: 4, kind: input, shape index: {}]   ;;  %s844_s5 = inlined_call_operand.hbm [shape: f32[128,128], index: 5, kind: input, shape index: {}]   ;;  %s845_s6 = inlined_call_operand.vmem [shape: f32[1,128], index: 6, kind: input, shape index: {}]   ;;  %s846_s7 = inlined_call_operand.hbm [shape: f32[8,128], index: 7, kind: output, shape index: {}]  }
   0x1   :  { %13 = vsyncpa [#allocation6], 0 }
   0x2   :  { %14 = vsyncpa [#allocation9], 0 }
   0x3   :  { %15 = vsyncpa [#allocation4], 0  ;;  %s704_s24 = smov [#allocation5]  }
   0x4   :  { %s31_s25 = sshll.u32 %s704_s24, 4  ;;  %s32_s25 = int_to_ptr.vmem [resolvable:$true] %s31_s25 }
   0x5   :  { %s584_s26 = scalar_lea.vmem %s32_s25, 512  ;;  %p589_p1 = scmp.lt.s32.totalorder %s32_s25, %s32_s25 }
   0x6   :  { %p585_p0 = scmp.ne.s32.totalorder %s32_s25, %s584_s26  ;;  %p590_p2 = scmp.lt.s32.totalorder %s584_s26, %s584_s26 }
   0x8   :  { %p591_p3 = por %p590_p2, %p589_p1 }
   0xa   :  { %p592_p4 = pnand %p591_p3, %p585_p0 }
   0xc   :  { %595 = shalt.err (!%p592_p4)
}
   0xd   :  { %s705_s27 = smov 128   ;;  %s706_s28 = smov 8  }
   0xe   :  { %37 = dma.hbm_to_vmem [thread:$0]  %s840_s1, 512, %s32_s25, [#allocation6], %s705_s27, %s705_s27, %s706_s28  }
   0xf   :  { %s707_s8 = smov [#allocation8]   ;;  %s708_s10 = smov [#allocation2]  }
  0x10   :  { %s53_s9 = sshll.u32 %s707_s8, 4  ;;  %s22_s11 = sshll.u32 %s708_s10, 4  ;;  %s54_s9 = int_to_ptr.vmem [resolvable:$true] %s53_s9  ;;  %s23_s11 = int_to_ptr.vmem [resolvable:$true] %s22_s11 }
  0x11   :  { %s604_s12 = scalar_lea.vmem %s54_s9, 2048  ;;  %p609_p6 = scmp.lt.s32.totalorder %s54_s9, %s54_s9 }
  0x12   :  { %p605_p5 = scmp.ne.s32.totalorder %s54_s9, %s604_s12  ;;  %p610_p7 = scmp.lt.s32.totalorder %s604_s12, %s604_s12 }
  0x14   :  { %p611_p8 = por %p610_p7, %p609_p6 }
  0x16   :  { %p612_p9 = pnand %p611_p8, %p605_p5 }
  0x18   :  { %615 = shalt.err (!%p612_p9)
}
  0x19   :  { %59 = dma.hbm_to_vmem [thread:$0]  %s842_s3, 2048, %s54_s9, [#allocation9], %s705_s27, %s705_s27, %s706_s28  }
  0x1a   :  { %s624_s1 = scalar_lea.vmem %s23_s11, 128  ;;  %p629_p11 = scmp.lt.s32.totalorder %s23_s11, %s23_s11 }
  0x1b   :  { %p625_p10 = scmp.ne.s32.totalorder %s23_s11, %s624_s1  ;;  %p630_p12 = scmp.lt.s32.totalorder %s624_s1, %s624_s1 }
  0x1d   :  { %p631_p13 = por %p630_p12, %p629_p11 }
  0x1f   :  { %p632_p0 = pnand %p631_p13, %p625_p10 }
  0x21   :  { %635 = shalt.err (!%p632_p0)
}
  0x22   :  { %25 = dma.hbm_to_vmem [thread:$0]  %s839_s0, 128, %s23_s11, [#allocation3]  }
  0x23   :  { %s709_s17 = smov [#allocation7]   ;;  %s710_s19 = smov [#allocation10]  }
  0x24   :  { %s44_s18 = sshll.u32 %s709_s17, 4  ;;  %s67_s20 = sshll.u32 %s710_s19, 4  ;;  %s45_s18 = int_to_ptr.vmem [resolvable:$true] %s44_s18  ;;  %s68_s20 = int_to_ptr.vmem [resolvable:$true] %s67_s20 }
  0x25   :  { %s644_s21 = scalar_lea.vmem %s45_s18, 64  ;;  %p649_p2 = scmp.lt.s32.totalorder %s45_s18, %s45_s18 }
  0x26   :  { %p645_p1 = scmp.ne.s32.totalorder %s45_s18, %s644_s21  ;;  %p650_p3 = scmp.lt.s32.totalorder %s644_s21, %s644_s21 }
  0x28   :  { %p651_p4 = por %p650_p3, %p649_p2 }
  0x2a   :  { %p652_p5 = pnand %p651_p4, %p645_p1 }
  0x2c   :  { %655 = shalt.err (!%p652_p5)
}
  0x2d   :  { %47 = dma.hbm_to_vmem [thread:$0]  %s841_s2, 64, %s45_s18, [#allocation6]  }
  0x2e   :  { %s664_s23 = scalar_lea.vmem %s68_s20, 2048  ;;  %p669_p7 = scmp.lt.s32.totalorder %s68_s20, %s68_s20 }
  0x2f   :  { %p665_p6 = scmp.ne.s32.totalorder %s68_s20, %s664_s23  ;;  %p670_p8 = scmp.lt.s32.totalorder %s664_s23, %s664_s23 }
  0x31   :  { %p671_p9 = por %p670_p8, %p669_p7 }
  0x33   :  { %p672_p10 = pnand %p671_p9, %p665_p6 }
  0x35   :  { %675 = shalt.err (!%p672_p10)
}
  0x36   :  { %73 = dma.hbm_to_vmem [thread:$0]  %s844_s5, 2048, %s68_s20, [#allocation9], %s705_s27, %s705_s27, %s706_s28  }
  0x37   :  { %696 = dma.done.wait [#allocation3], 128  }
  0x38   :  { %697 = vsyncadd [#allocation3], 4294967168 }
  0x39   :  { %698 = dma.done.wait [#allocation6], 576  }
  0x3a   :  { %699 = vsyncadd [#allocation6], 4294966720 }
  0x3b   :  { %700 = dma.done.wait [#allocation9], 4096  }
  0x3c   :  { %701 = vsyncadd [#allocation9], 4294963200  ;;  %v711_v0 = vmov 0.0   ;;  %vm712_vm0 = vmmov 0   ;;  %v95_v1 = vld [vmem:[#allocation5 + $0x18] sm:$0xff]  ;;  %v94_v2 = vld [vmem:[#allocation5 + $0x10] sm:$0xff]  ;;  %v198_v44 = vlaneseq }
  0x3d   :  { %481 = vmatprep.subr.mxu0 %v711_v0  ;;  %489 = vmatprep.mubr.msk.f32.mxu0 %vm712_vm0, %v711_v0  ;;  %v93_v3 = vld [vmem:[#allocation5 + $0x8] sm:$0xff]  ;;  %v92_v4 = vld [vmem:[#allocation5] sm:$0xff]  ;;  %v91_v5 = vld [vmem:[#allocation2] sm:$0xff]  ;;  %vm101_vm1 = vcmask 261120   ;;  %s713_s29 = smov [#allocation11]  }
  0x3e   :  { %492 = vmatprep.subr.mxu1 %v711_v0  ;;  %524 = vmatprep.mubr.msk.f32.mxu1 %vm712_vm0, %v711_v0  ;;  %v223_v6 = vld [vmem:[#allocation8 + $0x78] sm:$0xff]  ;;  %v222_v7 = vld [vmem:[#allocation8 + $0x70] sm:$0xff]  ;;  %v221_v8 = vld [vmem:[#allocation8 + $0x68] sm:$0xff]  ;;  %v805_v45 = vshrl.u32 %v198_v44, 7  ;;  %s426_s30 = sshll.u32 %s713_s29, 4  ;;  %s427_s30 = int_to_ptr.vmem [resolvable:$true] %s426_s30 }
  0x3f   :  { %482 = vmatpush3.msra.mxu0 %v95_v1  ;;  %493 = vmatpush3.msra.mxu1 %v223_v6  ;;  %v220_v9 = vld [vmem:[#allocation8 + $0x60] sm:$0xff]  ;;  %v219_v10 = vld [vmem:[#allocation8 + $0x58] sm:$0xff]  ;;  %v218_v11 = vld [vmem:[#allocation8 + $0x50] sm:$0xff]  ;;  %s676_s8 = scalar_lea.vmem %s427_s30, 128  ;;  %p681_p12 = scmp.lt.s32.totalorder %s427_s30, %s427_s30 }
  0x40   :  { %483 = vmatprep.subr.mxu0 %v711_v0  ;;  %494 = vmatprep.subr.mxu1 %v711_v0  ;;  %v217_v12 = vld [vmem:[#allocation8 + $0x48] sm:$0xff]  ;;  %v216_v13 = vld [vmem:[#allocation8 + $0x40] sm:$0xff]  ;;  %v215_v14 = vld [vmem:[#allocation8 + $0x38] sm:$0xff]  ;;  %v200_v47 = vsub.s32 0, %v805_v45  ;;  %p677_p11 = scmp.ne.s32.totalorder %s427_s30, %s676_s8  ;;  %p682_p13 = scmp.lt.s32.totalorder %s676_s8, %s676_s8 }
  0x41   :  { %484 = vmatpush3.msra.mxu0 %v94_v2  ;;  %495 = vmatpush3.msra.mxu1 %v222_v7  ;;  %v214_v15 = vld [vmem:[#allocation8 + $0x30] sm:$0xff]  ;;  %v213_v16 = vld [vmem:[#allocation8 + $0x28] sm:$0xff]  ;;  %v212_v17 = vld [vmem:[#allocation8 + $0x20] sm:$0xff] }
  0x42   :  { %485 = vmatprep.subr.mxu0 %v711_v0  ;;  %496 = vmatprep.subr.mxu1 %v711_v0  ;;  %v211_v18 = vld [vmem:[#allocation8 + $0x18] sm:$0xff]  ;;  %v210_v19 = vld [vmem:[#allocation8 + $0x10] sm:$0xff]  ;;  %v209_v20 = vld [vmem:[#allocation8 + $0x8] sm:$0xff]  ;;  %p683_p0 = por %p682_p13, %p681_p12 }
  0x43   :  { %486 = vmatpush3.msra.mxu0 %v93_v3  ;;  %497 = vmatpush3.msra.mxu1 %v221_v8  ;;  %v208_v21 = vld [vmem:[#allocation8] sm:$0xff]  ;;  %v437_v22 = vld [vmem:[#allocation7] ss:$0 sm:$0xff]  ;;  %v176_v46 = vld [vmem:[#allocation7 + $0x1] sm:$0x1] }
  0x44   :  { %487 = vmatprep.subr.mxu0 %v711_v0  ;;  %498 = vmatprep.subr.mxu1 %v711_v0  ;;  %v439_v51 = vld [vmem:[#allocation7 + $0x2] ss:$0 sm:$0xff]  ;;  %v340_v55 = vld [vmem:[#allocation10 + $0x70] sm:$0xff]  ;;  %v339_v56 = vld [vmem:[#allocation10 + $0x68] sm:$0xff]  ;;  %p684_p1 = pnand %p683_p0, %p677_p11 }
  0x45   :  { %488 = vmatpush3.msra.mxu0 %v92_v4  ;;  %499 = vmatpush3.msra.mxu1 %v220_v9  ;;  %v341_v54 = vld [vmem:[#allocation10 + $0x78] sm:$0xff]  ;;  %v338_v57 = vld [vmem:[#allocation10 + $0x60] sm:$0xff]  ;;  %v336_v59 = vld [vmem:[#allocation10 + $0x50] sm:$0xff] }
  0x46   :  { %490 = vmatmul.mubr.msk.f32.vlgmr.msra.gmra.mxu0 %vm101_vm1, %v91_v5  ;;  %527 = vmatprep.subr.mxu0 %v711_v0  ;;  %v337_v58 = vld [vmem:[#allocation10 + $0x58] sm:$0xff]  ;;  %v335_v60 = vld [vmem:[#allocation10 + $0x48] sm:$0xff]  ;;  %v334_v61 = vld [vmem:[#allocation10 + $0x40] sm:$0xff] }
  0x47   :  { %559 = vmatprep.mubr.msk.f32.mxu0 %vm712_vm0, %v711_v0  ;;  %500 = vmatprep.subr.mxu1 %v711_v0  ;;  %v333_v62 = vld [vmem:[#allocation10 + $0x38] sm:$0xff]  ;;  %v332_v63 = vld [vmem:[#allocation10 + $0x30] sm:$0xff]  ;;  %v331_v1 = vld [vmem:[#allocation10 + $0x28] sm:$0xff] }
  0x48   :  { %501 = vmatpush3.msra.mxu1 %v219_v10  ;;  %528 = vmatpush3.msra.mxu0 %v341_v54  ;;  %v330_v2 = vld [vmem:[#allocation10 + $0x20] sm:$0xff]  ;;  %v329_v3 = vld [vmem:[#allocation10 + $0x18] sm:$0xff]  ;;  %v328_v4 = vld [vmem:[#allocation10 + $0x10] sm:$0xff] }
  0x49   :  { %502 = vmatprep.subr.mxu1 %v711_v0  ;;  %529 = vmatprep.subr.mxu0 %v711_v0  ;;  %v327_v5 = vld [vmem:[#allocation10 + $0x8] sm:$0xff]  ;;  %v326_v6 = vld [vmem:[#allocation10] sm:$0xff] }
  0x4a   :  { %503 = vmatpush3.msra.mxu1 %v218_v11  ;;  %530 = vmatpush3.msra.mxu0 %v340_v55 }
  0x4b   :  { %504 = vmatprep.subr.mxu1 %v711_v0  ;;  %531 = vmatprep.subr.mxu0 %v711_v0 }
  0x4c   :  { %505 = vmatpush3.msra.mxu1 %v217_v12  ;;  %532 = vmatpush3.msra.mxu0 %v339_v56 }
  0x4d   :  { %506 = vmatprep.subr.mxu1 %v711_v0  ;;  %533 = vmatprep.subr.mxu0 %v711_v0 }
  0x4e   :  { %507 = vmatpush3.msra.mxu1 %v216_v13  ;;  %534 = vmatpush3.msra.mxu0 %v338_v57 }
  0x4f   :  { %508 = vmatprep.subr.mxu1 %v711_v0  ;;  %535 = vmatprep.subr.mxu0 %v711_v0 }
  0x50   :  { %509 = vmatpush3.msra.mxu1 %v215_v14  ;;  %536 = vmatpush3.msra.mxu0 %v337_v58 }
  0x51   :  { %510 = vmatprep.subr.mxu1 %v711_v0  ;;  %537 = vmatprep.subr.mxu0 %v711_v0 }
  0x52   :  { %511 = vmatpush3.msra.mxu1 %v214_v15  ;;  %538 = vmatpush3.msra.mxu0 %v336_v59 }
  0x53   :  { %512 = vmatprep.subr.mxu1 %v711_v0  ;;  %539 = vmatprep.subr.mxu0 %v711_v0 }
  0x54   :  { %513 = vmatpush3.msra.mxu1 %v213_v16  ;;  %540 = vmatpush3.msra.mxu0 %v335_v60 }
  0x55   :  { %514 = vmatprep.subr.mxu1 %v711_v0  ;;  %541 = vmatprep.subr.mxu0 %v711_v0 }
  0x56   :  { %515 = vmatpush3.msra.mxu1 %v212_v17  ;;  %542 = vmatpush3.msra.mxu0 %v334_v61 }
  0x57   :  { %516 = vmatprep.subr.mxu1 %v711_v0  ;;  %543 = vmatprep.subr.mxu0 %v711_v0 }
  0x58   :  { %517 = vmatpush3.msra.mxu1 %v211_v18  ;;  %544 = vmatpush3.msra.mxu0 %v333_v62 }
  0x59   :  { %518 = vmatprep.subr.mxu1 %v711_v0  ;;  %545 = vmatprep.subr.mxu0 %v711_v0 }
  0x5a   :  { %519 = vmatpush3.msra.mxu1 %v210_v19  ;;  %546 = vmatpush3.msra.mxu0 %v332_v63 }
  0x5b   :  { %520 = vmatprep.subr.mxu1 %v711_v0  ;;  %547 = vmatprep.subr.mxu0 %v711_v0 }
  0x5c   :  { %521 = vmatpush3.msra.mxu1 %v209_v20  ;;  %548 = vmatpush3.msra.mxu0 %v331_v1 }
  0x5d   :  { %522 = vmatprep.subr.mxu1 %v711_v0  ;;  %549 = vmatprep.subr.mxu0 %v711_v0 }
  0x5e   :  { %523 = vmatpush3.msra.mxu1 %v208_v21  ;;  %550 = vmatpush3.msra.mxu0 %v330_v2 }
  0x5f   :  { %551 = vmatprep.subr.mxu0 %v711_v0 }
  0x60   :  { %552 = vmatpush3.msra.mxu0 %v329_v3 }
  0x61   :  { %553 = vmatprep.subr.mxu0 %v711_v0 }
  0x62   :  { %554 = vmatpush3.msra.mxu0 %v328_v4 }
  0x63   :  { %555 = vmatprep.subr.mxu0 %v711_v0 }
  0x64   :  { %556 = vmatpush3.msra.mxu0 %v327_v5 }
  0x65   :  { %557 = vmatprep.subr.mxu0 %v711_v0 }
  0x66   :  { %558 = vmatpush3.msra.mxu0 %v326_v6 }
 0x106   :  { %v171_v23 = vpop.f32.mrf.mxu0 }
 0x107   :  { %v172_v24 = vadd.f32 %v437_v22, %v171_v23 }
 0x108   :  { %v491_v25 = vpop.f32.mrf.mxu0 }
 0x109   :  { %v175_v26 = vmax.f32 %v172_v24, 0.0  ;;  %v294_v25 = vld [vmem:[%s843_s4] sm:$0x1] }
 0x10b   :  { %v178_v27 = vrot.slane %v175_v26, 4 }
 0x10d   :  { %v179_v28 = vadd.f32 %v178_v27, %v175_v26 }
 0x10f   :  { %v180_v29 = vrot.slane %v179_v28, 2 }
 0x111   :  { %v181_v30 = vadd.f32 %v180_v29, %v179_v28  ;;  %v440_v29 = vld [vmem:[%s843_s4 + $0x1] ss:$0 sm:$0xff] }
 0x113   :  { %v182_v31 = vrot.slane %v181_v30, 1 }
 0x115   :  { %v183_v32 = vadd.f32 %v182_v31, %v181_v30 }
 0x117   :  { %v185_v33 = vmul.f32 0.125, %v183_v32 }
 0x119   :  { %v186_v34 = vsub.f32 %v175_v26, %v185_v33  ;;  %v441_v33 = vld [vmem:[%s845_s6] ss:$0 sm:$0xff] }
 0x11b   :  { %v187_v35 = vmul.f32 %v186_v34, %v186_v34 }
 0x11d   :  { %v188_v36 = vrot.slane %v187_v35, 4 }
 0x11f   :  { %v189_v37 = vadd.f32 %v188_v36, %v187_v35 }
 0x121   :  { %v190_v38 = vrot.slane %v189_v37, 2 }
 0x123   :  { %v191_v39 = vadd.f32 %v190_v38, %v189_v37 }
 0x125   :  { %v192_v40 = vrot.slane %v191_v39, 1 }
 0x127   :  { %v193_v41 = vadd.f32 %v192_v40, %v191_v39 }
 0x129   :  { %v194_v42 = vmul.f32 0.125, %v193_v41 }
 0x12b   :  { %v195_v43 = vadd.f32 1e-05, %v194_v42 }
 0x12d   :  { %572 = vrsqrt.f32 %v195_v43 }
 0x13a   :  { %v573_v48 = vpop.eup %572 }
 0x13b   :  { %v197_v49 = vmul.f32 %v573_v48, %v176_v46 }
 0x13d   :  { %v201_v50 = vrot.slane %v197_v49, %v200_v47 }
 0x13f   :  { %v202_v52 = vmul.f32 %v201_v50, %v186_v34 }
 0x141   :  { %v207_v53 = vadd.f32 %v439_v51, %v202_v52 }
 0x143   :  { %525 = vmatmul.mubr.f32.vlgmr.msra.gmra.mxu1 %v207_v53 }
 0x203   :  { %v290_v7 = vpop.f32.mrf.mxu1 }
 0x204   :  { %v296_v8 = vrot.slane %v290_v7, 4 }
 0x205   :  { %v526_v9 = vpop.f32.mrf.mxu1 }
 0x206   :  { %v297_v10 = vadd.f32 %v296_v8, %v290_v7 }
 0x208   :  { %v298_v11 = vrot.slane %v297_v10, 2 }
 0x20a   :  { %v299_v12 = vadd.f32 %v298_v11, %v297_v10 }
 0x20c   :  { %v300_v13 = vrot.slane %v299_v12, 1 }
 0x20e   :  { %v301_v14 = vadd.f32 %v300_v13, %v299_v12 }
 0x210   :  { %v302_v15 = vmul.f32 0.125, %v301_v14 }
 0x212   :  { %v303_v16 = vsub.f32 %v290_v7, %v302_v15 }
 0x214   :  { %v304_v17 = vmul.f32 %v303_v16, %v303_v16 }
 0x216   :  { %v305_v18 = vrot.slane %v304_v17, 4 }
 0x218   :  { %v306_v19 = vadd.f32 %v305_v18, %v304_v17 }
 0x21a   :  { %v307_v20 = vrot.slane %v306_v19, 2 }
 0x21c   :  { %v308_v21 = vadd.f32 %v307_v20, %v306_v19 }
 0x21e   :  { %v309_v22 = vrot.slane %v308_v21, 1 }
 0x220   :  { %v310_v23 = vadd.f32 %v309_v22, %v308_v21 }
 0x222   :  { %v311_v24 = vmul.f32 0.125, %v310_v23 }
 0x224   :  { %v312_v0 = vadd.f32 1e-05, %v311_v24 }
 0x226   :  { %574 = vrsqrt.f32 %v312_v0 }
 0x233   :  { %v575_v26 = vpop.eup %574 }
 0x234   :  { %v314_v27 = vmul.f32 %v575_v26, %v294_v25 }
 0x236   :  { %v318_v28 = vrot.slane %v314_v27, %v200_v47 }
 0x238   :  { %v319_v30 = vmul.f32 %v318_v28, %v303_v16 }
 0x23a   :  { %v324_v31 = vadd.f32 %v440_v29, %v319_v30 }
 0x23c   :  { %v325_v32 = vmax.f32 %v324_v31, 0.0 }
 0x23e   :  { %560 = vmatmul.mubr.f32.vlgmr.msra.gmra.mxu0 %v325_v32 }
 0x2fe   :  { %v415_v34 = vpop.f32.mrf.mxu0 }
 0x2ff   :  { %v416_v35 = vadd.f32 %v441_v33, %v415_v34 }
 0x300   :  { %v561_v36 = vpop.f32.mrf.mxu0 }
 0x301   :  { %419 = vst [vmem:[#allocation11] sm:$0xff] %v416_v35 }
 0x302   :  { %687 = shalt.err (!%p684_p1)
}
 0x303   :  { %429 = dma.vmem_to_hbm [thread:$0]  %s427_s30, 128, %s846_s7, [#allocation4]  }
 0x304   :  { %702 = dma.done.wait [#allocation4], 128  }
 0x305   :  { %703 = vsyncadd [#allocation4], 4294967168 }
 0x306   :  { %433 = vsyncpa [#allocation3], 1 }
 0x307   :  { %434 = vsyncpa [#allocation6], 1 }
 0x308   :  { %435 = vsyncpa [#allocation9], 1 }
 0x309   :  { %436 = vsyncpa [#allocation4], 1 }

</bundles_post_ra>
